<compile_context>
chip_gen: v6e
topology: v6e:2x2x1
jax: 0.10.0
libtpu: 0.0.40
codegen_flags: <defaults>
</compile_context>

<pallas_src>
import functools

import jax
import jax.numpy as jnp
from jax import lax
from jax.experimental import pallas as pl
from jax.experimental.pallas import tpu as pltpu


def _round_up(x, m):
    return (x + m - 1) // m * m


# ----------------------------------------------------------------------------
# Kernel 1: hoisted input projection   pre = x @ W_ih^T + (b_ih + b_hh)
# Fully parallel over time chunks; bf16 MXU matmul, f32 accumulation.
# ----------------------------------------------------------------------------
def _proj_kernel(x_ref, wihT_ref, b_ref, pre_ref):
    # x_ref: (R, I) bf16, wihT_ref: (I, Hp) bf16, b_ref: (1, Hp) f32
    pre = jnp.dot(x_ref[...], wihT_ref[...],
                  preferred_element_type=jnp.float32)
    pre_ref[...] = pre + b_ref[...]


# ----------------------------------------------------------------------------
# Kernel 2: sequential recurrence   h_t = tanh(pre_t + h_{t-1} @ W_hh^T)
# Grid = (batch blocks ["parallel"], time chunks ["arbitrary"]).
# Only the truly sequential matmul + tanh lives in the hot loop.
# ----------------------------------------------------------------------------
def _recurrence_kernel(pre_ref, h0_ref, whhT_ref, out_ref, h_scratch, *, unroll):
    # pre_ref: (TC, BB, Hp) f32, h0_ref: (BB, Hp) f32, whhT_ref: (Hp, Hp) bf16
    # out_ref: (TC, BB, Hp) f32, h_scratch: (BB, Hp) f32 (carried across chunks)
    c = pl.program_id(1)  # time-chunk index (inner, sequential axis)

    @pl.when(c == 0)
    def _():
        h_scratch[...] = h0_ref[...]

    whhT = whhT_ref[...]          # resident bf16 weights (loop invariant)
    tc = pre_ref.shape[0]

    def step(t, h):
        # bf16 MXU matmul with f32 accumulation; pre-activations stay in f32.
        s = pre_ref[t] + jnp.dot(h.astype(jnp.bfloat16), whhT,
                                 preferred_element_type=jnp.float32)
        h_new = jnp.tanh(s)
        out_ref[t] = h_new
        return h_new

    # TODO(synk): for very large H, drive the MXU weight-stationary via
    # pltpu.matmul_push_rhs / matmul_acc_lhs / matmul_pop instead of jnp.dot.
    h_last = lax.fori_loop(0, tc, step, h_scratch[...], unroll=unroll)
    h_scratch[...] = h_last


def rnn_forward(x, h0, w_ih, w_hh, b_ih, b_hh, *, time_chunk=64):
    """x: [T, B, I]; h0: [B, H]; returns (outputs [T, B, H], final_hidden [B, H])."""
    T, B, I = x.shape
    H = w_ih.shape[0]

    # ---- Tiling --------------------------------------------------------------
    Hp = _round_up(H, 128)                 # hidden dim on lanes
    if B >= 16:
        Bp = _round_up(B, 16)              # two batch blocks -> both TCs on v7x
        BB = Bp // 2
    else:
        Bp = _round_up(B, 8)               # sublane alignment only
        BB = Bp
    nb = Bp // BB

    TC = max(1, min(time_chunk, T))        # time steps per grid step
    if (TC * Bp) % 16:                     # keep bf16 x row-slabs tile-aligned
        TC += 1
    Tp = _round_up(T, TC)
    nt = Tp // TC
    R = TC * Bp                            # projection rows per grid step

    f32, bf16 = jnp.float32, jnp.bfloat16

    # Inputs: bf16 for the MXU.  Feature dim I stays unpadded (full-extent
    # blocks), batch padded only to a sublane multiple, time padded to TC.
    x_p = jnp.zeros((Tp, Bp, I), bf16).at[:T, :B, :].set(x.astype(bf16))
    x_rows = x_p.reshape(Tp * Bp, I)

    h0_p = jnp.zeros((Bp, Hp), f32).at[:B, :H].set(h0.astype(f32))
    wihT = jnp.zeros((I, Hp), bf16).at[:, :H].set(w_ih.T.astype(bf16))
    whhT = jnp.zeros((Hp, Hp), bf16).at[:H, :H].set(w_hh.T.astype(bf16))
    bias = jnp.zeros((1, Hp), f32).at[0, :H].set((b_ih + b_hh).astype(f32))

    # VMEM budgets: double-buffered streaming slabs + resident weights, with
    # headroom, capped at 48 MiB (comfortably inside v7x's 64 MiB).
    cap = 48 * 1024 * 1024
    proj_bytes = 2 * (R * I * 2 + R * Hp * 4) + I * Hp * 2 + Hp * 4
    rec_bytes = (2 * (2 * TC * BB * Hp * 4 + BB * Hp * 4)
                 + Hp * Hp * 2 + BB * Hp * 4)
    proj_vmem = int(min(cap, max(16 * 1024 * 1024, 2 * proj_bytes)))
    rec_vmem = int(min(cap, max(16 * 1024 * 1024, 2 * rec_bytes)))

    # ---- Kernel 1: input projection (parallel over time chunks) -------------
    pre_rows = pl.pallas_call(
        _proj_kernel,
        out_shape=jax.ShapeDtypeStruct((Tp * Bp, Hp), f32),
        grid=(nt,),
        in_specs=[
            pl.BlockSpec((R, I), lambda c: (c, 0)),      # x row-chunk (bf16)
            pl.BlockSpec((I, Hp), lambda c: (0, 0)),     # W_ih^T (resident)
            pl.BlockSpec((1, Hp), lambda c: (0, 0)),     # b_ih + b_hh
        ],
        out_specs=pl.BlockSpec((R, Hp), lambda c: (c, 0)),
        compiler_params=pltpu.CompilerParams(
            dimension_semantics=("parallel",),
            vmem_limit_bytes=proj_vmem,
        ),
    )(x_rows, wihT, bias)
    pre = pre_rows.reshape(Tp, Bp, Hp)     # row-major reinterpretation (cheap)

    # ---- Kernel 2: sequential recurrence -------------------------------------
    unroll = int(min(TC, 8))               # cap unroll -> bounded vreg pressure
    out_p = pl.pallas_call(
        functools.partial(_recurrence_kernel, unroll=unroll),
        out_shape=jax.ShapeDtypeStruct((Tp, Bp, Hp), f32),
        grid_spec=pltpu.PrefetchScalarGridSpec(
            num_scalar_prefetch=0,
            grid=(nb, nt),
            in_specs=[
                pl.BlockSpec((TC, BB, Hp), lambda b, c: (c, b, 0)),  # pre chunk
                pl.BlockSpec((BB, Hp), lambda b, c: (b, 0)),         # h0 block
                pl.BlockSpec((Hp, Hp), lambda b, c: (0, 0)),         # W_hh^T
            ],
            out_specs=pl.BlockSpec((TC, BB, Hp), lambda b, c: (c, b, 0)),
            scratch_shapes=[pltpu.VMEM((BB, Hp), jnp.float32)],      # carried h
        ),
        compiler_params=pltpu.CompilerParams(
            dimension_semantics=("parallel", "arbitrary"),
            vmem_limit_bytes=rec_vmem,
        ),
    )(pre, h0_p, whhT)

    outputs = out_p[:T, :B, :H]
    h_final = outputs[-1]                  # h_T; no separate kernel output
    return outputs, h_final


def _rnn_reference(x, h0, w_ih, w_hh, b_ih, b_hh):
    """Pure-JAX f32 reference (same math as torch.nn.RNN with tanh)."""
    def step(h, x_t):
        h_new = jnp.tanh(x_t @ w_ih.T + h @ w_hh.T + b_ih + b_hh)
        return h_new, h_new
    h_final, outs = lax.scan(step, h0.astype(jnp.float32), x.astype(jnp.float32))
    return outs.astype(jnp.float32), h_final.astype(jnp.float32)


if __name__ == "__main__":
    # Small deterministic setup consistent with the module's forward signature:
    # input [sequence_length, batch_size, input_size], hidden_size units.
    seq_len, batch, input_size, hidden_size = 8, 2, 16, 32

    key = jax.random.PRNGKey(0)
    kx, k1, k2, k3, k4 = jax.random.split(key, 5)

    scale = 1.0 / jnp.sqrt(hidden_size)
    x = jax.random.normal(kx, (seq_len, batch, input_size), dtype=jnp.float32)
    w_ih = jax.random.uniform(k1, (hidden_size, input_size), jnp.float32, -scale, scale)
    w_hh = jax.random.uniform(k2, (hidden_size, hidden_size), jnp.float32, -scale, scale)
    b_ih = jax.random.uniform(k3, (hidden_size,), jnp.float32, -scale, scale)
    b_hh = jax.random.uniform(k4, (hidden_size,), jnp.float32, -scale, scale)

    # init_hidden semantics: zeros when no hidden state is provided.
    h0 = jnp.zeros((batch, hidden_size), dtype=jnp.float32)

    fwd = jax.jit(rnn_forward)
    outputs, h_final = fwd(x, h0, w_ih, w_hh, b_ih, b_hh)
    jax.block_until_ready((outputs, h_final))

    ref_out, ref_h = _rnn_reference(x, h0, w_ih, w_hh, b_ih, b_hh)
    assert outputs.shape == (seq_len, batch, hidden_size)
    assert h_final.shape == (batch, hidden_size)
    # bf16 MXU matmuls with f32 accumulation -> loosened tolerance vs f32 ref.
    assert jnp.allclose(outputs, ref_out, atol=3e-2, rtol=3e-2)
    assert jnp.allclose(h_final, ref_h, atol=3e-2, rtol=3e-2)

    print("KERNEL_OK")
</pallas_src>

<mosaic_0001>
module attributes {stable_mosaic.version = 11 : i64} {
  func.func @_proj_kernel(%arg0: i32, %arg1: memref<64x16xbf16, #tpu.memory_space<vmem>>, %arg2: memref<16x128xbf16, #tpu.memory_space<vmem>>, %arg3: memref<1x128xf32, #tpu.memory_space<vmem>>, %arg4: memref<64x128xf32, #tpu.memory_space<vmem>>) attributes {dimension_semantics = [#tpu.dimension_semantics<parallel>], iteration_bounds = array<i64: 1>, scalar_prefetch = 0 : i64, scratch_operands = 0 : i64, tpu.core_type = #tpu.core_type<tc>, window_params = [{transform_indices = @transform_0, window_bounds = array<i64: 64, 16>}, {pipeline_mode = #tpu.pipeline_mode<synchronous>, transform_indices = @transform_1, window_bounds = array<i64: 16, 128>}, {pipeline_mode = #tpu.pipeline_mode<synchronous>, transform_indices = @transform_2, window_bounds = array<i64: 1, 128>}, {transform_indices = @transform_3, window_bounds = array<i64: 64, 128>}]} {
    %c0 = arith.constant 0 : index
    %c0_0 = arith.constant 0 : index
    %0 = vector.load %arg1[%c0, %c0_0] : memref<64x16xbf16, #tpu.memory_space<vmem>>, vector<64x16xbf16>
    %c0_1 = arith.constant 0 : index
    %c0_2 = arith.constant 0 : index
    %1 = vector.load %arg2[%c0_1, %c0_2] : memref<16x128xbf16, #tpu.memory_space<vmem>>, vector<16x128xbf16>
    %cst = arith.constant dense<0.000000e+00> : vector<64x128xf32>
    %2 = tpu.matmul %0, %1, %cst {dimension_numbers = #tpu.dot_dimension_numbers<[1], [0], [0], [1], [0, 0, 1, 1], [], []>} : vector<64x16xbf16>, vector<16x128xbf16>, vector<64x128xf32> -> vector<64x128xf32>
    %c0_3 = arith.constant 0 : index
    %c0_4 = arith.constant 0 : index
    %3 = vector.load %arg3[%c0_3, %c0_4] : memref<1x128xf32, #tpu.memory_space<vmem>>, vector<1x128xf32>
    %4 = vector.broadcast %3 : vector<1x128xf32> to vector<64x128xf32>
    %5 = arith.addf %2, %4 : vector<64x128xf32>
    %c0_5 = arith.constant 0 : index
    %c0_6 = arith.constant 0 : index
    %6 = vector.load %arg4[%c0_5, %c0_6] : memref<64x128xf32, #tpu.memory_space<vmem>>, vector<64x128xf32>
    tpu.vector_store %arg4[%c0_5, %c0_6], %5 {strides = array<i32>} : memref<64x128xf32, #tpu.memory_space<vmem>>, vector<64x128xf32>,
    return
  }
  func.func @transform_0(%arg0: i32) -> (i32, i32) {
    %c0_i32 = arith.constant 0 : i32
    %c0_i32_0 = arith.constant 0 : i32
    return %arg0, %c0_i32 : i32, i32
  }
  func.func @transform_1(%arg0: i32) -> (i32, i32) {
    %c0_i32 = arith.constant 0 : i32
    %c0_i32_0 = arith.constant 0 : i32
    %c0_i32_1 = arith.constant 0 : i32
    return %c0_i32, %c0_i32_0 : i32, i32
  }
  func.func @transform_2(%arg0: i32) -> (i32, i32) {
    %c0_i32 = arith.constant 0 : i32
    %c0_i32_0 = arith.constant 0 : i32
    %c0_i32_1 = arith.constant 0 : i32
    return %c0_i32, %c0_i32_0 : i32, i32
  }
  func.func @transform_3(%arg0: i32) -> (i32, i32) {
    %c0_i32 = arith.constant 0 : i32
    %c0_i32_0 = arith.constant 0 : i32
    return %arg0, %c0_i32 : i32, i32
  }
}

module attributes {stable_mosaic.version = 11 : i64} {
  func.func @_recurrence_kernel(%arg0: i32, %arg1: i32, %arg2: memref<8x8x128xf32, #tpu.memory_space<vmem>>, %arg3: memref<8x128xf32, #tpu.memory_space<vmem>>, %arg4: memref<128x128xbf16, #tpu.memory_space<vmem>>, %arg5: memref<8x8x128xf32, #tpu.memory_space<vmem>>, %arg6: memref<8x128xf32, #tpu.memory_space<vmem>>) attributes {dimension_semantics = [#tpu.dimension_semantics<parallel>, #tpu.dimension_semantics<arbitrary>], iteration_bounds = array<i64: 1, 1>, scalar_prefetch = 0 : i64, scratch_operands = 1 : i64, tpu.core_type = #tpu.core_type<tc>, window_params = [{transform_indices = @transform_0, window_bounds = array<i64: 8, 8, 128>}, {transform_indices = @transform_1, window_bounds = array<i64: 8, 128>}, {pipeline_mode = #tpu.pipeline_mode<synchronous>, transform_indices = @transform_2, window_bounds = array<i64: 128, 128>}, {transform_indices = @transform_3, window_bounds = array<i64: 8, 8, 128>}]} {
    %c0_i32 = arith.constant 0 : i32
    %0 = arith.cmpi eq, %arg1, %c0_i32 : i32
    %1 = arith.extui %0 : i1 to i32
    %c0_i32_0 = arith.constant 0 : i32
    %2 = arith.cmpi ne, %1, %c0_i32_0 : i32
    scf.if %2 {
      %c0_46 = arith.constant 0 : index
      %c0_47 = arith.constant 0 : index
      %94 = vector.load %arg3[%c0_46, %c0_47] : memref<8x128xf32, #tpu.memory_space<vmem>>, vector<8x128xf32>
      %c0_48 = arith.constant 0 : index
      %c0_49 = arith.constant 0 : index
      %95 = vector.load %arg6[%c0_48, %c0_49] : memref<8x128xf32, #tpu.memory_space<vmem>>, vector<8x128xf32>
      tpu.vector_store %arg6[%c0_48, %c0_49], %94 {strides = array<i32>} : memref<8x128xf32, #tpu.memory_space<vmem>>, vector<8x128xf32>,
    } else {
    }
    %c0 = arith.constant 0 : index
    %c0_1 = arith.constant 0 : index
    %3 = vector.load %arg4[%c0, %c0_1] : memref<128x128xbf16, #tpu.memory_space<vmem>>, vector<128x128xbf16>
    %c0_2 = arith.constant 0 : index
    %c0_3 = arith.constant 0 : index
    %4 = vector.load %arg6[%c0_2, %c0_3] : memref<8x128xf32, #tpu.memory_space<vmem>>, vector<8x128xf32>
    %c0_i32_4 = arith.constant 0 : i32
    %5 = arith.index_cast %c0_i32_4 : i32 to index
    %c0_5 = arith.constant 0 : index
    %c0_6 = arith.constant 0 : index
    %6 = vector.load %arg2[%5, %c0_5, %c0_6] : memref<8x8x128xf32, #tpu.memory_space<vmem>>, vector<1x8x128xf32>
    %7 = vector.shape_cast %6 : vector<1x8x128xf32> to vector<8x128xf32>
    %8 = arith.truncf %4 : vector<8x128xf32> to vector<8x128xbf16>
    %cst = arith.constant dense<0.000000e+00> : vector<8x128xf32>
    %9 = tpu.matmul %8, %3, %cst {dimension_numbers = #tpu.dot_dimension_numbers<[1], [0], [0], [1], [0, 0, 1, 1], [], []>} : vector<8x128xbf16>, vector<128x128xbf16>, vector<8x128xf32> -> vector<8x128xf32>
    %10 = arith.addf %7, %9 : vector<8x128xf32>
    %11 = math.tanh %10 : vector<8x128xf32>
    %12 = arith.index_cast %c0_i32_4 : i32 to index
    %c0_7 = arith.constant 0 : index
    %c0_8 = arith.constant 0 : index
    %13 = vector.load %arg5[%12, %c0_7, %c0_8] : memref<8x8x128xf32, #tpu.memory_space<vmem>>, vector<1x8x128xf32>
    %14 = vector.shape_cast %13 : vector<1x8x128xf32> to vector<8x128xf32>
    %15 = vector.shape_cast %11 : vector<8x128xf32> to vector<1x8x128xf32>
    tpu.vector_store %arg5[%12, %c0_7, %c0_8], %15 {strides = array<i32>} : memref<8x8x128xf32, #tpu.memory_space<vmem>>, vector<1x8x128xf32>,
    %c1_i32 = arith.constant 1 : i32
    %16 = arith.index_cast %c1_i32 : i32 to index
    %c0_9 = arith.constant 0 : index
    %c0_10 = arith.constant 0 : index
    %17 = vector.load %arg2[%16, %c0_9, %c0_10] : memref<8x8x128xf32, #tpu.memory_space<vmem>>, vector<1x8x128xf32>
    %18 = vector.shape_cast %17 : vector<1x8x128xf32> to vector<8x128xf32>
    %19 = arith.truncf %11 : vector<8x128xf32> to vector<8x128xbf16>
    %cst_11 = arith.constant dense<0.000000e+00> : vector<8x128xf32>
    %20 = tpu.matmul %19, %3, %cst_11 {dimension_numbers = #tpu.dot_dimension_numbers<[1], [0], [0], [1], [0, 0, 1, 1], [], []>} : vector<8x128xbf16>, vector<128x128xbf16>, vector<8x128xf32> -> vector<8x128xf32>
    %21 = arith.addf %18, %20 : vector<8x128xf32>
    %22 = math.tanh %21 : vector<8x128xf32>
    %23 = arith.index_cast %c1_i32 : i32 to index
    %c0_12 = arith.constant 0 : index
    %c0_13 = arith.constant 0 : index
    %24 = vector.load %arg5[%23, %c0_12, %c0_13] : memref<8x8x128xf32, #tpu.memory_space<vmem>>, vector<1x8x128xf32>
    %25 = vector.shape_cast %24 : vector<1x8x128xf32> to vector<8x128xf32>
    %26 = vector.shape_cast %22 : vector<8x128xf32> to vector<1x8x128xf32>
    tpu.vector_store %arg5[%23, %c0_12, %c0_13], %26 {strides = array<i32>} : memref<8x8x128xf32, #tpu.memory_space<vmem>>, vector<1x8x128xf32>,
    %c2_i32 = arith.constant 2 : i32
    %27 = arith.index_cast %c2_i32 : i32 to index
    %c0_14 = arith.constant 0 : index
    %c0_15 = arith.constant 0 : index
    %28 = vector.load %arg2[%27, %c0_14, %c0_15] : memref<8x8x128xf32, #tpu.memory_space<vmem>>, vector<1x8x128xf32>
    %29 = vector.shape_cast %28 : vector<1x8x128xf32> to vector<8x128xf32>
    %30 = arith.truncf %22 : vector<8x128xf32> to vector<8x128xbf16>
    %cst_16 = arith.constant dense<0.000000e+00> : vector<8x128xf32>
    %31 = tpu.matmul %30, %3, %cst_16 {dimension_numbers = #tpu.dot_dimension_numbers<[1], [0], [0], [1], [0, 0, 1, 1], [], []>} : vector<8x128xbf16>, vector<128x128xbf16>, vector<8x128xf32> -> vector<8x128xf32>
    %32 = arith.addf %29, %31 : vector<8x128xf32>
    %33 = math.tanh %32 : vector<8x128xf32>
    %34 = arith.index_cast %c2_i32 : i32 to index
    %c0_17 = arith.constant 0 : index
    %c0_18 = arith.constant 0 : index
    %35 = vector.load %arg5[%34, %c0_17, %c0_18] : memref<8x8x128xf32, #tpu.memory_space<vmem>>, vector<1x8x128xf32>
    %36 = vector.shape_cast %35 : vector<1x8x128xf32> to vector<8x128xf32>
    %37 = vector.shape_cast %33 : vector<8x128xf32> to vector<1x8x128xf32>
    tpu.vector_store %arg5[%34, %c0_17, %c0_18], %37 {strides = array<i32>} : memref<8x8x128xf32, #tpu.memory_space<vmem>>, vector<1x8x128xf32>,
    %c3_i32 = arith.constant 3 : i32
    %38 = arith.index_cast %c3_i32 : i32 to index
    %c0_19 = arith.constant 0 : index
    %c0_20 = arith.constant 0 : index
    %39 = vector.load %arg2[%38, %c0_19, %c0_20] : memref<8x8x128xf32, #tpu.memory_space<vmem>>, vector<1x8x128xf32>
    %40 = vector.shape_cast %39 : vector<1x8x128xf32> to vector<8x128xf32>
    %41 = arith.truncf %33 : vector<8x128xf32> to vector<8x128xbf16>
    %cst_21 = arith.constant dense<0.000000e+00> : vector<8x128xf32>
    %42 = tpu.matmul %41, %3, %cst_21 {dimension_numbers = #tpu.dot_dimension_numbers<[1], [0], [0], [1], [0, 0, 1, 1], [], []>} : vector<8x128xbf16>, vector<128x128xbf16>, vector<8x128xf32> -> vector<8x128xf32>
    %43 = arith.addf %40, %42 : vector<8x128xf32>
    %44 = math.tanh %43 : vector<8x128xf32>
    %45 = arith.index_cast %c3_i32 : i32 to index
    %c0_22 = arith.constant 0 : index
    %c0_23 = arith.constant 0 : index
    %46 = vector.load %arg5[%45, %c0_22, %c0_23] : memref<8x8x128xf32, #tpu.memory_space<vmem>>, vector<1x8x128xf32>
    %47 = vector.shape_cast %46 : vector<1x8x128xf32> to vector<8x128xf32>
    %48 = vector.shape_cast %44 : vector<8x128xf32> to vector<1x8x128xf32>
    tpu.vector_store %arg5[%45, %c0_22, %c0_23], %48 {strides = array<i32>} : memref<8x8x128xf32, #tpu.memory_space<vmem>>, vector<1x8x128xf32>,
    %c4_i32 = arith.constant 4 : i32
    %49 = arith.index_cast %c4_i32 : i32 to index
    %c0_24 = arith.constant 0 : index
    %c0_25 = arith.constant 0 : index
    %50 = vector.load %arg2[%49, %c0_24, %c0_25] : memref<8x8x128xf32, #tpu.memory_space<vmem>>, vector<1x8x128xf32>
    %51 = vector.shape_cast %50 : vector<1x8x128xf32> to vector<8x128xf32>
    %52 = arith.truncf %44 : vector<8x128xf32> to vector<8x128xbf16>
    %cst_26 = arith.constant dense<0.000000e+00> : vector<8x128xf32>
    %53 = tpu.matmul %52, %3, %cst_26 {dimension_numbers = #tpu.dot_dimension_numbers<[1], [0], [0], [1], [0, 0, 1, 1], [], []>} : vector<8x128xbf16>, vector<128x128xbf16>, vector<8x128xf32> -> vector<8x128xf32>
    %54 = arith.addf %51, %53 : vector<8x128xf32>
    %55 = math.tanh %54 : vector<8x128xf32>
    %56 = arith.index_cast %c4_i32 : i32 to index
    %c0_27 = arith.constant 0 : index
    %c0_28 = arith.constant 0 : index
    %57 = vector.load %arg5[%56, %c0_27, %c0_28] : memref<8x8x128xf32, #tpu.memory_space<vmem>>, vector<1x8x128xf32>
    %58 = vector.shape_cast %57 : vector<1x8x128xf32> to vector<8x128xf32>
    %59 = vector.shape_cast %55 : vector<8x128xf32> to vector<1x8x128xf32>
    tpu.vector_store %arg5[%56, %c0_27, %c0_28], %59 {strides = array<i32>} : memref<8x8x128xf32, #tpu.memory_space<vmem>>, vector<1x8x128xf32>,
    %c5_i32 = arith.constant 5 : i32
    %60 = arith.index_cast %c5_i32 : i32 to index
    %c0_29 = arith.constant 0 : index
    %c0_30 = arith.constant 0 : index
    %61 = vector.load %arg2[%60, %c0_29, %c0_30] : memref<8x8x128xf32, #tpu.memory_space<vmem>>, vector<1x8x128xf32>
    %62 = vector.shape_cast %61 : vector<1x8x128xf32> to vector<8x128xf32>
    %63 = arith.truncf %55 : vector<8x128xf32> to vector<8x128xbf16>
    %cst_31 = arith.constant dense<0.000000e+00> : vector<8x128xf32>
    %64 = tpu.matmul %63, %3, %cst_31 {dimension_numbers = #tpu.dot_dimension_numbers<[1], [0], [0], [1], [0, 0, 1, 1], [], []>} : vector<8x128xbf16>, vector<128x128xbf16>, vector<8x128xf32> -> vector<8x128xf32>
    %65 = arith.addf %62, %64 : vector<8x128xf32>
    %66 = math.tanh %65 : vector<8x128xf32>
    %67 = arith.index_cast %c5_i32 : i32 to index
    %c0_32 = arith.constant 0 : index
    %c0_33 = arith.constant 0 : index
    %68 = vector.load %arg5[%67, %c0_32, %c0_33] : memref<8x8x128xf32, #tpu.memory_space<vmem>>, vector<1x8x128xf32>
    %69 = vector.shape_cast %68 : vector<1x8x128xf32> to vector<8x128xf32>
    %70 = vector.shape_cast %66 : vector<8x128xf32> to vector<1x8x128xf32>
    tpu.vector_store %arg5[%67, %c0_32, %c0_33], %70 {strides = array<i32>} : memref<8x8x128xf32, #tpu.memory_space<vmem>>, vector<1x8x128xf32>,
    %c6_i32 = arith.constant 6 : i32
    %71 = arith.index_cast %c6_i32 : i32 to index
    %c0_34 = arith.constant 0 : index
    %c0_35 = arith.constant 0 : index
    %72 = vector.load %arg2[%71, %c0_34, %c0_35] : memref<8x8x128xf32, #tpu.memory_space<vmem>>, vector<1x8x128xf32>
    %73 = vector.shape_cast %72 : vector<1x8x128xf32> to vector<8x128xf32>
    %74 = arith.truncf %66 : vector<8x128xf32> to vector<8x128xbf16>
    %cst_36 = arith.constant dense<0.000000e+00> : vector<8x128xf32>
    %75 = tpu.matmul %74, %3, %cst_36 {dimension_numbers = #tpu.dot_dimension_numbers<[1], [0], [0], [1], [0, 0, 1, 1], [], []>} : vector<8x128xbf16>, vector<128x128xbf16>, vector<8x128xf32> -> vector<8x128xf32>
    %76 = arith.addf %73, %75 : vector<8x128xf32>
    %77 = math.tanh %76 : vector<8x128xf32>
    %78 = arith.index_cast %c6_i32 : i32 to index
    %c0_37 = arith.constant 0 : index
    %c0_38 = arith.constant 0 : index
    %79 = vector.load %arg5[%78, %c0_37, %c0_38] : memref<8x8x128xf32, #tpu.memory_space<vmem>>, vector<1x8x128xf32>
    %80 = vector.shape_cast %79 : vector<1x8x128xf32> to vector<8x128xf32>
    %81 = vector.shape_cast %77 : vector<8x128xf32> to vector<1x8x128xf32>
    tpu.vector_store %arg5[%78, %c0_37, %c0_38], %81 {strides = array<i32>} : memref<8x8x128xf32, #tpu.memory_space<vmem>>, vector<1x8x128xf32>,
    %c7_i32 = arith.constant 7 : i32
    %82 = arith.index_cast %c7_i32 : i32 to index
    %c0_39 = arith.constant 0 : index
    %c0_40 = arith.constant 0 : index
    %83 = vector.load %arg2[%82, %c0_39, %c0_40] : memref<8x8x128xf32, #tpu.memory_space<vmem>>, vector<1x8x128xf32>
    %84 = vector.shape_cast %83 : vector<1x8x128xf32> to vector<8x128xf32>
    %85 = arith.truncf %77 : vector<8x128xf32> to vector<8x128xbf16>
    %cst_41 = arith.constant dense<0.000000e+00> : vector<8x128xf32>
    %86 = tpu.matmul %85, %3, %cst_41 {dimension_numbers = #tpu.dot_dimension_numbers<[1], [0], [0], [1], [0, 0, 1, 1], [], []>} : vector<8x128xbf16>, vector<128x128xbf16>, vector<8x128xf32> -> vector<8x128xf32>
    %87 = arith.addf %84, %86 : vector<8x128xf32>
    %88 = math.tanh %87 : vector<8x128xf32>
    %89 = arith.index_cast %c7_i32 : i32 to index
    %c0_42 = arith.constant 0 : index
    %c0_43 = arith.constant 0 : index
    %90 = vector.load %arg5[%89, %c0_42, %c0_43] : memref<8x8x128xf32, #tpu.memory_space<vmem>>, vector<1x8x128xf32>
    %91 = vector.shape_cast %90 : vector<1x8x128xf32> to vector<8x128xf32>
    %92 = vector.shape_cast %88 : vector<8x128xf32> to vector<1x8x128xf32>
    tpu.vector_store %arg5[%89, %c0_42, %c0_43], %92 {strides = array<i32>} : memref<8x8x128xf32, #tpu.memory_space<vmem>>, vector<1x8x128xf32>,
    %c8_i32 = arith.constant 8 : i32
    %c0_44 = arith.constant 0 : index
    %c0_45 = arith.constant 0 : index
    %93 = vector.load %arg6[%c0_44, %c0_45] : memref<8x128xf32, #tpu.memory_space<vmem>>, vector<8x128xf32>
    tpu.vector_store %arg6[%c0_44, %c0_45], %88 {strides = array<i32>} : memref<8x128xf32, #tpu.memory_space<vmem>>, vector<8x128xf32>,
    return
  }
  func.func @transform_0(%arg0: i32, %arg1: i32) -> (i32, i32, i32) {
    %c0_i32 = arith.constant 0 : i32
    %c0_i32_0 = arith.constant 0 : i32
    return %arg1, %arg0, %c0_i32 : i32, i32, i32
  }
  func.func @transform_1(%arg0: i32, %arg1: i32) -> (i32, i32) {
    %c0_i32 = arith.constant 0 : i32
    %c0_i32_0 = arith.constant 0 : i32
    return %arg0, %c0_i32 : i32, i32
  }
  func.func @transform_2(%arg0: i32, %arg1: i32) -> (i32, i32) {
    %c0_i32 = arith.constant 0 : i32
    %c0_i32_0 = arith.constant 0 : i32
    %c0_i32_1 = arith.constant 0 : i32
    return %c0_i32, %c0_i32_0 : i32, i32
  }
  func.func @transform_3(%arg0: i32, %arg1: i32) -> (i32, i32, i32) {
    %c0_i32 = arith.constant 0 : i32
    %c0_i32_0 = arith.constant 0 : i32
    return %arg1, %arg0, %c0_i32 : i32, i32, i32
  }
}

</mosaic_0001>

<bundles_post_ra>
// kernel: rnn_forward.2
= control target key start
LH: loop header
LB: loop body
LE: loop exit
PB: predicated region body
PF: predicated region fallthrough
CT: control target
= control target key end

     0   :  { %vm58_vm0 = vcmask 130048   ;;  %s242_s1 = inlined_call_operand.vmem [shape: bf16[16,128], index: 1, kind: input, shape index: {}]   ;;  %s243_s0 = inlined_call_operand.vmem [shape: bf16[64,16], index: 0, kind: input, shape index: {}]   ;;  %s244_s2 = inlined_call_operand.vmem [shape: f32[1,128], index: 2, kind: input, shape index: {}]   ;;  %s245_s3 = inlined_call_operand.vmem [shape: f32[64,128], index: 3, kind: output, shape index: {}]  }
   0x1   :  { %v175_v0 = vld [vmem:[%s242_s1] sm:$0xff]   ;;  %v177_v2 = vld [vmem:[%s243_s0 + $0x10] sm:$0xff]   ;;  %v178_v3 = vld [vmem:[%s243_s0 + $0x8] sm:$0xff]  }
   0x2   :  { %v176_v1 = vld [vmem:[%s243_s0] sm:$0xff]   ;;  %163 = vmatprep.subr.bf16.mxu0 %v175_v0  ;;  %173 = vmatprep.subr.bf16.mxu1 %v175_v0  ;;  %v179_v4 = vld [vmem:[%s243_s0 + $0x18] sm:$0xff]  }
   0x3   :  { %164 = vmatpush3.bf16.msra.mxu0 %v175_v0  ;;  %174 = vmatpush3.bf16.msra.mxu1 %v175_v0  ;;  %v148_v5 = vld [vmem:[%s244_s2] ss:$0 sm:$0xff] }
   0x4   :  { %165 = vmatprep.mubr.msk.bf16.mxu0 %vm58_vm0, %v176_v1  ;;  %169 = vmatprep.mubr.msk.bf16.mxu1 %vm58_vm0, %v177_v2 }
   0x6   :  { %166 = vmatmul.mubr.msk.bf16.vlgmr.msra.gmra.mxu0 %vm58_vm0, %v178_v3  ;;  %170 = vmatmul.mubr.msk.bf16.vlgmr.msra.gmra.mxu1 %vm58_vm0, %v179_v4 }
  0xc6   :  { %v167_v6 = vpop.f32.mrf.mxu0  ;;  %v171_v7 = vpop.f32.mrf.mxu1 }
  0xc7   :  { %v114_v8 = vadd.f32 %v167_v6, %v148_v5  ;;  %v130_v9 = vadd.f32 %v171_v7, %v148_v5 }
  0xc8   :  { %v105_v10 = vpop.f32.mrf.mxu0  ;;  %v121_v11 = vpop.f32.mrf.mxu1 }
  0xc9   :  { %138 = vst [vmem:[%s245_s3 + $0x10] sm:$0xff] %v114_v8  ;;  %142 = vst [vmem:[%s245_s3 + $0x30] sm:$0xff] %v130_v9  ;;  %v106_v12 = vadd.f32 %v148_v5, %v105_v10  ;;  %v122_v13 = vadd.f32 %v148_v5, %v121_v11 }
  0xca   :  { %v168_v14 = vpop.f32.mrf.mxu0  ;;  %v172_v15 = vpop.f32.mrf.mxu1 }
  0xcb   :  { %136 = vst [vmem:[%s245_s3] sm:$0xff] %v106_v12  ;;  %140 = vst [vmem:[%s245_s3 + $0x20] sm:$0xff] %v122_v13  ;;  %v117_v16 = vadd.f32 %v168_v14, %v148_v5  ;;  %v133_v17 = vadd.f32 %v172_v15, %v148_v5 }
  0xcc   :  { %v108_v18 = vpop.f32.mrf.mxu0  ;;  %v124_v19 = vpop.f32.mrf.mxu1 }
  0xcd   :  { %139 = vst [vmem:[%s245_s3 + $0x18] sm:$0xff] %v117_v16  ;;  %143 = vst [vmem:[%s245_s3 + $0x38] sm:$0xff] %v133_v17  ;;  %v109_v20 = vadd.f32 %v148_v5, %v108_v18  ;;  %v125_v21 = vadd.f32 %v148_v5, %v124_v19 }
  0xcf   :  { %137 = vst [vmem:[%s245_s3 + $0x8] sm:$0xff] %v109_v20  ;;  %141 = vst [vmem:[%s245_s3 + $0x28] sm:$0xff] %v125_v21 }

// kernel: rnn_forward.3
= control target key start
LH: loop header
LB: loop body
LE: loop exit
PB: predicated region body
PF: predicated region fallthrough
CT: control target
= control target key end

     0   :  { %v745_v0 = vmov 0.0   ;;  %vm746_vm0 = vmmov 0   ;;  %s1002_s2 = inlined_call_operand.vmem [shape: bf16[128,128], index: 2, kind: input, shape index: {}]   ;;  %s1003_s1 = inlined_call_operand.vmem [shape: f32[8,128], index: 1, kind: input, shape index: {}]   ;;  %s1004_s0 = inlined_call_operand.vmem [shape: f32[8,8,128], index: 0, kind: input, shape index: {}]   ;;  %s1005_s3 = inlined_call_operand.vmem [shape: f32[8,8,128], index: 3, kind: output, shape index: {}]  }
   0x1   :  { %559 = vmatprep.subr.bf16.mxu0 %v745_v0  ;;  %v771_v1 = vld [vmem:[%s1002_s2 + $0x38] sm:$0xff]   ;;  %575 = vmatprep.mubr.msk.bf16.mxu0 %vm746_vm0, %v745_v0  ;;  %v782_v2 = vld [vmem:[%s1002_s2 + $0x30] sm:$0xff]   ;;  %v791_v3 = vld [vmem:[%s1002_s2 + $0x28] sm:$0xff]  }
   0x2   :  { %579 = vmatprep.subr.bf16.mxu1 %v745_v0  ;;  %595 = vmatprep.mubr.msk.bf16.mxu1 %vm746_vm0, %v745_v0  ;;  %v800_v4 = vld [vmem:[%s1002_s2 + $0x20] sm:$0xff]   ;;  %v809_v5 = vld [vmem:[%s1002_s2 + $0x18] sm:$0xff]   ;;  %v818_v6 = vld [vmem:[%s1002_s2 + $0x10] sm:$0xff]  }
   0x3   :  { %560 = vmatpush3.bf16.msra.mxu0 %v771_v1  ;;  %580 = vmatpush3.bf16.msra.mxu1 %v771_v1  ;;  %v827_v7 = vld [vmem:[%s1002_s2 + $0x8] sm:$0xff]   ;;  %v836_v8 = vld [vmem:[%s1002_s2] sm:$0xff]   ;;  %v475_v27 = vld [vmem:[%s1004_s0 + $0x10] sm:$0xff] }
   0x4   :  { %561 = vmatprep.subr.bf16.mxu0 %v745_v0  ;;  %581 = vmatprep.subr.bf16.mxu1 %v745_v0  ;;  %v19_v9 = vld [vmem:[%s1003_s1] sm:$0xff]  ;;  %v473_v19 = vld [vmem:[%s1004_s0 + $0x8] sm:$0xff]  ;;  %v477_v35 = vld [vmem:[%s1004_s0 + $0x18] sm:$0xff] }
   0x5   :  { %v39_v10 = vpack.c.bf16 %v19_v9, %v19_v9  ;;  %v38_v11 = vld [vmem:[%s1004_s0] sm:$0xff]  ;;  %v481_v51 = vld [vmem:[%s1004_s0 + $0x28] sm:$0xff]  ;;  %v483_v59 = vld [vmem:[%s1004_s0 + $0x30] sm:$0xff] }
   0x6   :  { %v479_v43 = vld [vmem:[%s1004_s0 + $0x20] sm:$0xff] }
   0x7   :  { %562 = vmatpush3.bf16.msra.mxu0 %v782_v2  ;;  %582 = vmatpush3.bf16.msra.mxu1 %v782_v2 }
   0x8   :  { %563 = vmatprep.subr.bf16.mxu0 %v745_v0  ;;  %583 = vmatprep.subr.bf16.mxu1 %v745_v0 }
   0xb   :  { %564 = vmatpush3.bf16.msra.mxu0 %v791_v3  ;;  %584 = vmatpush3.bf16.msra.mxu1 %v791_v3 }
   0xc   :  { %565 = vmatprep.subr.bf16.mxu0 %v745_v0  ;;  %585 = vmatprep.subr.bf16.mxu1 %v745_v0 }
   0xf   :  { %566 = vmatpush3.bf16.msra.mxu0 %v800_v4  ;;  %586 = vmatpush3.bf16.msra.mxu1 %v800_v4 }
  0x10   :  { %567 = vmatprep.subr.bf16.mxu0 %v745_v0  ;;  %587 = vmatprep.subr.bf16.mxu1 %v745_v0 }
  0x13   :  { %568 = vmatpush3.bf16.msra.mxu0 %v809_v5  ;;  %588 = vmatpush3.bf16.msra.mxu1 %v809_v5 }
  0x14   :  { %569 = vmatprep.subr.bf16.mxu0 %v745_v0  ;;  %589 = vmatprep.subr.bf16.mxu1 %v745_v0 }
  0x17   :  { %570 = vmatpush3.bf16.msra.mxu0 %v818_v6  ;;  %590 = vmatpush3.bf16.msra.mxu1 %v818_v6 }
  0x18   :  { %571 = vmatprep.subr.bf16.mxu0 %v745_v0  ;;  %591 = vmatprep.subr.bf16.mxu1 %v745_v0 }
  0x1b   :  { %572 = vmatpush3.bf16.msra.mxu0 %v827_v7  ;;  %592 = vmatpush3.bf16.msra.mxu1 %v827_v7 }
  0x1c   :  { %573 = vmatprep.subr.bf16.mxu0 %v745_v0  ;;  %593 = vmatprep.subr.bf16.mxu1 %v745_v0 }
  0x1f   :  { %574 = vmatpush3.bf16.msra.mxu0 %v836_v8  ;;  %594 = vmatpush3.bf16.msra.mxu1 %v836_v8 }
  0x20   :  { %599 = vmatprep.subr.bf16.mxu0 %v745_v0  ;;  %619 = vmatprep.subr.bf16.mxu1 %v745_v0 }
  0x22   :  { %576 = vmatmul.mubr.bf16.vlgmr.msra.gmra.mxu0 %v39_v10 }
  0x23   :  { %600 = vmatpush3.bf16.msra.mxu0 %v771_v1  ;;  %615 = vmatprep.mubr.msk.bf16.mxu0 %vm746_vm0, %v745_v0 }
  0x24   :  { %601 = vmatprep.subr.bf16.mxu0 %v745_v0 }
  0x27   :  { %602 = vmatpush3.bf16.msra.mxu0 %v782_v2 }
  0x28   :  { %603 = vmatprep.subr.bf16.mxu0 %v745_v0 }
  0x2b   :  { %604 = vmatpush3.bf16.msra.mxu0 %v791_v3 }
  0x2c   :  { %605 = vmatprep.subr.bf16.mxu0 %v745_v0 }
  0x2f   :  { %606 = vmatpush3.bf16.msra.mxu0 %v800_v4 }
  0x30   :  { %607 = vmatprep.subr.bf16.mxu0 %v745_v0 }
  0x33   :  { %608 = vmatpush3.bf16.msra.mxu0 %v809_v5 }
  0x34   :  { %609 = vmatprep.subr.bf16.mxu0 %v745_v0 }
  0x37   :  { %610 = vmatpush3.bf16.msra.mxu0 %v818_v6 }
  0x38   :  { %611 = vmatprep.subr.bf16.mxu0 %v745_v0 }
  0x3b   :  { %612 = vmatpush3.bf16.msra.mxu0 %v827_v7 }
  0x3c   :  { %613 = vmatprep.subr.bf16.mxu0 %v745_v0 }
  0x3f   :  { %614 = vmatpush3.bf16.msra.mxu0 %v836_v8 }
  0x40   :  { %639 = vmatprep.subr.bf16.mxu0 %v745_v0 }
  0xe2   :  { %v122_v12 = vpop.f32.mrf.mxu0 }
  0xe3   :  { %v128_v13 = vadd.f32 %v122_v12, %v38_v11 }
  0xe4   :  { %v577_v14 = vpop.f32.mrf.mxu0 }
  0xe5   :  { %729 = vtanh.f32 %v128_v13 }
  0xe6   :  { %v125_v15 = vpop.f32.mrf.mxu0 }
  0xe8   :  { %v578_v16 = vpop.f32.mrf.mxu0 }
  0xf2   :  { %v730_v17 = vpop.eup %729 }
  0xf3   :  { %130 = vst [vmem:[%s1005_s3] sm:$0xff] %v730_v17  ;;  %v133_v18 = vpack.c.bf16 %v730_v17, %v730_v17 }
  0xf5   :  { %596 = vmatmul.mubr.bf16.vlgmr.msra.gmra.mxu1 %v133_v18 }
  0xf6   :  { %620 = vmatpush3.bf16.msra.mxu1 %v771_v1  ;;  %635 = vmatprep.mubr.msk.bf16.mxu1 %vm746_vm0, %v745_v0 }
  0xf7   :  { %621 = vmatprep.subr.bf16.mxu1 %v745_v0 }
  0xfa   :  { %622 = vmatpush3.bf16.msra.mxu1 %v782_v2 }
  0xfb   :  { %623 = vmatprep.subr.bf16.mxu1 %v745_v0 }
  0xfe   :  { %624 = vmatpush3.bf16.msra.mxu1 %v791_v3 }
  0xff   :  { %625 = vmatprep.subr.bf16.mxu1 %v745_v0 }
 0x102   :  { %626 = vmatpush3.bf16.msra.mxu1 %v800_v4 }
 0x103   :  { %627 = vmatprep.subr.bf16.mxu1 %v745_v0 }
 0x106   :  { %628 = vmatpush3.bf16.msra.mxu1 %v809_v5 }
 0x107   :  { %629 = vmatprep.subr.bf16.mxu1 %v745_v0 }
 0x10a   :  { %630 = vmatpush3.bf16.msra.mxu1 %v818_v6 }
 0x10b   :  { %631 = vmatprep.subr.bf16.mxu1 %v745_v0 }
 0x10e   :  { %632 = vmatpush3.bf16.msra.mxu1 %v827_v7 }
 0x10f   :  { %633 = vmatprep.subr.bf16.mxu1 %v745_v0 }
 0x112   :  { %634 = vmatpush3.bf16.msra.mxu1 %v836_v8 }
 0x113   :  { %659 = vmatprep.subr.bf16.mxu1 %v745_v0 }
 0x1b5   :  { %v168_v20 = vpop.f32.mrf.mxu1 }
 0x1b6   :  { %v174_v21 = vadd.f32 %v473_v19, %v168_v20 }
 0x1b7   :  { %v597_v22 = vpop.f32.mrf.mxu1 }
 0x1b8   :  { %731 = vtanh.f32 %v174_v21 }
 0x1b9   :  { %v171_v23 = vpop.f32.mrf.mxu1 }
 0x1bb   :  { %v598_v24 = vpop.f32.mrf.mxu1 }
 0x1c5   :  { %v732_v25 = vpop.eup %731 }
 0x1c6   :  { %474 = vst [vmem:[%s1005_s3 + $0x8] sm:$0xff] %v732_v25  ;;  %v180_v26 = vpack.c.bf16 %v732_v25, %v732_v25 }
 0x1c8   :  { %616 = vmatmul.mubr.bf16.vlgmr.msra.gmra.mxu0 %v180_v26 }
 0x1c9   :  { %640 = vmatpush3.bf16.msra.mxu0 %v771_v1  ;;  %655 = vmatprep.mubr.msk.bf16.mxu0 %vm746_vm0, %v745_v0 }
 0x1ca   :  { %641 = vmatprep.subr.bf16.mxu0 %v745_v0 }
 0x1cd   :  { %642 = vmatpush3.bf16.msra.mxu0 %v782_v2 }
 0x1ce   :  { %643 = vmatprep.subr.bf16.mxu0 %v745_v0 }
 0x1d1   :  { %644 = vmatpush3.bf16.msra.mxu0 %v791_v3 }
 0x1d2   :  { %645 = vmatprep.subr.bf16.mxu0 %v745_v0 }
 0x1d5   :  { %646 = vmatpush3.bf16.msra.mxu0 %v800_v4 }
 0x1d6   :  { %647 = vmatprep.subr.bf16.mxu0 %v745_v0 }
 0x1d9   :  { %648 = vmatpush3.bf16.msra.mxu0 %v809_v5 }
 0x1da   :  { %649 = vmatprep.subr.bf16.mxu0 %v745_v0 }
 0x1dd   :  { %650 = vmatpush3.bf16.msra.mxu0 %v818_v6 }
 0x1de   :  { %651 = vmatprep.subr.bf16.mxu0 %v745_v0 }
 0x1e1   :  { %652 = vmatpush3.bf16.msra.mxu0 %v827_v7 }
 0x1e2   :  { %653 = vmatprep.subr.bf16.mxu0 %v745_v0 }
 0x1e5   :  { %654 = vmatpush3.bf16.msra.mxu0 %v836_v8 }
 0x1e6   :  { %679 = vmatprep.subr.bf16.mxu0 %v745_v0 }
 0x288   :  { %v215_v28 = vpop.f32.mrf.mxu0 }
 0x289   :  { %v221_v29 = vadd.f32 %v475_v27, %v215_v28 }
 0x28a   :  { %v617_v30 = vpop.f32.mrf.mxu0 }
 0x28b   :  { %733 = vtanh.f32 %v221_v29 }
 0x28c   :  { %v218_v31 = vpop.f32.mrf.mxu0 }
 0x28e   :  { %v618_v32 = vpop.f32.mrf.mxu0 }
 0x298   :  { %v734_v33 = vpop.eup %733 }
 0x299   :  { %476 = vst [vmem:[%s1005_s3 + $0x10] sm:$0xff] %v734_v33  ;;  %v227_v34 = vpack.c.bf16 %v734_v33, %v734_v33 }
 0x29b   :  { %636 = vmatmul.mubr.bf16.vlgmr.msra.gmra.mxu1 %v227_v34 }
 0x29c   :  { %660 = vmatpush3.bf16.msra.mxu1 %v771_v1  ;;  %675 = vmatprep.mubr.msk.bf16.mxu1 %vm746_vm0, %v745_v0 }
 0x29d   :  { %661 = vmatprep.subr.bf16.mxu1 %v745_v0 }
 0x2a0   :  { %662 = vmatpush3.bf16.msra.mxu1 %v782_v2 }
 0x2a1   :  { %663 = vmatprep.subr.bf16.mxu1 %v745_v0 }
 0x2a4   :  { %664 = vmatpush3.bf16.msra.mxu1 %v791_v3 }
 0x2a5   :  { %665 = vmatprep.subr.bf16.mxu1 %v745_v0 }
 0x2a8   :  { %666 = vmatpush3.bf16.msra.mxu1 %v800_v4 }
 0x2a9   :  { %667 = vmatprep.subr.bf16.mxu1 %v745_v0 }
 0x2ac   :  { %668 = vmatpush3.bf16.msra.mxu1 %v809_v5 }
 0x2ad   :  { %669 = vmatprep.subr.bf16.mxu1 %v745_v0 }
 0x2b0   :  { %670 = vmatpush3.bf16.msra.mxu1 %v818_v6 }
 0x2b1   :  { %671 = vmatprep.subr.bf16.mxu1 %v745_v0 }
 0x2b4   :  { %672 = vmatpush3.bf16.msra.mxu1 %v827_v7 }
 0x2b5   :  { %673 = vmatprep.subr.bf16.mxu1 %v745_v0 }
 0x2b8   :  { %674 = vmatpush3.bf16.msra.mxu1 %v836_v8 }
 0x2b9   :  { %699 = vmatprep.subr.bf16.mxu1 %v745_v0 }
 0x35b   :  { %v262_v36 = vpop.f32.mrf.mxu1 }
 0x35c   :  { %v268_v37 = vadd.f32 %v477_v35, %v262_v36 }
 0x35d   :  { %v637_v38 = vpop.f32.mrf.mxu1 }
 0x35e   :  { %735 = vtanh.f32 %v268_v37 }
 0x35f   :  { %v265_v39 = vpop.f32.mrf.mxu1 }
 0x361   :  { %v638_v40 = vpop.f32.mrf.mxu1 }
 0x36b   :  { %v736_v41 = vpop.eup %735 }
 0x36c   :  { %478 = vst [vmem:[%s1005_s3 + $0x18] sm:$0xff] %v736_v41  ;;  %v274_v42 = vpack.c.bf16 %v736_v41, %v736_v41 }
 0x36e   :  { %656 = vmatmul.mubr.bf16.vlgmr.msra.gmra.mxu0 %v274_v42 }
 0x36f   :  { %680 = vmatpush3.bf16.msra.mxu0 %v771_v1  ;;  %695 = vmatprep.mubr.msk.bf16.mxu0 %vm746_vm0, %v745_v0 }
 0x370   :  { %681 = vmatprep.subr.bf16.mxu0 %v745_v0 }
 0x373   :  { %682 = vmatpush3.bf16.msra.mxu0 %v782_v2 }
 0x374   :  { %683 = vmatprep.subr.bf16.mxu0 %v745_v0 }
 0x377   :  { %684 = vmatpush3.bf16.msra.mxu0 %v791_v3 }
 0x378   :  { %685 = vmatprep.subr.bf16.mxu0 %v745_v0 }
 0x37b   :  { %686 = vmatpush3.bf16.msra.mxu0 %v800_v4 }
 0x37c   :  { %687 = vmatprep.subr.bf16.mxu0 %v745_v0 }
 0x37f   :  { %688 = vmatpush3.bf16.msra.mxu0 %v809_v5 }
 0x380   :  { %689 = vmatprep.subr.bf16.mxu0 %v745_v0 }
 0x383   :  { %690 = vmatpush3.bf16.msra.mxu0 %v818_v6 }
 0x384   :  { %691 = vmatprep.subr.bf16.mxu0 %v745_v0 }
 0x387   :  { %692 = vmatpush3.bf16.msra.mxu0 %v827_v7 }
 0x388   :  { %693 = vmatprep.subr.bf16.mxu0 %v745_v0 }
 0x38b   :  { %694 = vmatpush3.bf16.msra.mxu0 %v836_v8 }
 0x42e   :  { %v309_v44 = vpop.f32.mrf.mxu0 }
 0x42f   :  { %v315_v45 = vadd.f32 %v479_v43, %v309_v44 }
 0x430   :  { %v657_v46 = vpop.f32.mrf.mxu0 }
 0x431   :  { %737 = vtanh.f32 %v315_v45 }
 0x432   :  { %v312_v47 = vpop.f32.mrf.mxu0 }
 0x434   :  { %v658_v48 = vpop.f32.mrf.mxu0 }
 0x43e   :  { %v738_v49 = vpop.eup %737 }
 0x43f   :  { %480 = vst [vmem:[%s1005_s3 + $0x20] sm:$0xff] %v738_v49  ;;  %v321_v50 = vpack.c.bf16 %v738_v49, %v738_v49 }
 0x441   :  { %676 = vmatmul.mubr.bf16.vlgmr.msra.gmra.mxu1 %v321_v50 }
 0x442   :  { %700 = vmatpush3.bf16.msra.mxu1 %v771_v1  ;;  %715 = vmatprep.mubr.msk.bf16.mxu1 %vm746_vm0, %v745_v0 }
 0x443   :  { %701 = vmatprep.subr.bf16.mxu1 %v745_v0 }
 0x446   :  { %702 = vmatpush3.bf16.msra.mxu1 %v782_v2 }
 0x447   :  { %703 = vmatprep.subr.bf16.mxu1 %v745_v0 }
 0x44a   :  { %704 = vmatpush3.bf16.msra.mxu1 %v791_v3  ;;  %v485_v3 = vld [vmem:[%s1004_s0 + $0x38] sm:$0xff] }
 0x44b   :  { %705 = vmatprep.subr.bf16.mxu1 %v745_v0 }
 0x44e   :  { %706 = vmatpush3.bf16.msra.mxu1 %v800_v4 }
 0x44f   :  { %707 = vmatprep.subr.bf16.mxu1 %v745_v0 }
 0x452   :  { %708 = vmatpush3.bf16.msra.mxu1 %v809_v5 }
 0x453   :  { %709 = vmatprep.subr.bf16.mxu1 %v745_v0 }
 0x456   :  { %710 = vmatpush3.bf16.msra.mxu1 %v818_v6 }
 0x457   :  { %711 = vmatprep.subr.bf16.mxu1 %v745_v0 }
 0x45a   :  { %712 = vmatpush3.bf16.msra.mxu1 %v827_v7 }
 0x45b   :  { %713 = vmatprep.subr.bf16.mxu1 %v745_v0 }
 0x45e   :  { %714 = vmatpush3.bf16.msra.mxu1 %v836_v8 }
 0x501   :  { %v356_v52 = vpop.f32.mrf.mxu1 }
 0x502   :  { %v362_v53 = vadd.f32 %v481_v51, %v356_v52 }
 0x503   :  { %v677_v54 = vpop.f32.mrf.mxu1 }
 0x504   :  { %739 = vtanh.f32 %v362_v53 }
 0x505   :  { %v359_v55 = vpop.f32.mrf.mxu1 }
 0x507   :  { %v678_v56 = vpop.f32.mrf.mxu1 }
 0x511   :  { %v740_v57 = vpop.eup %739 }
 0x512   :  { %482 = vst [vmem:[%s1005_s3 + $0x28] sm:$0xff] %v740_v57  ;;  %v368_v58 = vpack.c.bf16 %v740_v57, %v740_v57 }
 0x514   :  { %696 = vmatmul.mubr.bf16.vlgmr.msra.gmra.mxu0 %v368_v58 }
 0x5d4   :  { %v403_v60 = vpop.f32.mrf.mxu0 }
 0x5d5   :  { %v409_v61 = vadd.f32 %v483_v59, %v403_v60 }
 0x5d6   :  { %v697_v62 = vpop.f32.mrf.mxu0 }
 0x5d7   :  { %741 = vtanh.f32 %v409_v61 }
 0x5d8   :  { %v406_v63 = vpop.f32.mrf.mxu0 }
 0x5da   :  { %v698_v0 = vpop.f32.mrf.mxu0 }
 0x5e4   :  { %v742_v1 = vpop.eup %741 }
 0x5e5   :  { %484 = vst [vmem:[%s1005_s3 + $0x30] sm:$0xff] %v742_v1  ;;  %v415_v2 = vpack.c.bf16 %v742_v1, %v742_v1 }
 0x5e7   :  { %716 = vmatmul.mubr.bf16.vlgmr.msra.gmra.mxu1 %v415_v2 }
 0x6a7   :  { %v450_v4 = vpop.f32.mrf.mxu1 }
 0x6a8   :  { %v456_v5 = vadd.f32 %v485_v3, %v450_v4 }
 0x6a9   :  { %v717_v6 = vpop.f32.mrf.mxu1 }
 0x6aa   :  { %743 = vtanh.f32 %v456_v5 }
 0x6ab   :  { %v453_v7 = vpop.f32.mrf.mxu1 }
 0x6ad   :  { %v718_v8 = vpop.f32.mrf.mxu1 }
 0x6b7   :  { %v744_v9 = vpop.eup %743 }
 0x6b8   :  { %486 = vst [vmem:[%s1005_s3 + $0x38] sm:$0xff] %v744_v9 }

</bundles_post_ra>
